<compile_context>
chip_gen: v7x
topology: tpu7x:2x2x1
jax: 0.10.0
libtpu: 0.0.40
codegen_flags: <defaults>
</compile_context>

<pallas_src>
import functools
import math

import jax
import jax.numpy as jnp
from jax.experimental import pallas as pl
from jax.experimental.pallas import tpu as pltpu


def _round_up(x: int, m: int) -> int:
    return ((x + m - 1) // m) * m


def mlp_kernel(x_ref, w1_ref, b1_ref, w2_ref, b2_ref, o_ref):
    # X arrives f32 (no wrapper-side cast round-trip); cast to the MXU dtype
    # in-register.
    x = x_ref[...].astype(w1_ref.dtype)
    # hidden = relu(X @ W1 + b1): bf16 MXU operands, f32 accumulate + epilogue.
    h = jnp.dot(x, w1_ref[...], preferred_element_type=jnp.float32)
    h = jnp.maximum(h + b1_ref[...], 0.0)
    # out = hidden @ W2 + b2 (hidden re-cast for the second MXU pass).
    y = jnp.dot(h.astype(w2_ref.dtype), w2_ref[...],
                preferred_element_type=jnp.float32)
    o_ref[...] = (y + b2_ref[...]).astype(o_ref.dtype)


def prepare_params(w1, b1, w2, b2, matmul_dtype=jnp.bfloat16):
    """One-time weight prep (do at model init, NOT inside the per-step jit)."""
    return (jnp.asarray(w1, matmul_dtype),
            jnp.asarray(b1, jnp.float32).reshape(1, -1),
            jnp.asarray(w2, matmul_dtype),
            jnp.asarray(b2, jnp.float32).reshape(1, -1))


def _batch_tiling(B, IN, HID, OUT, block_b, vmem_budget_bytes):
    # Balance tiles so the ragged tail wastes at most a fraction of one tile
    # (e.g. B=300 -> one 304-row tile, not 512), round to a 16-row granule
    # (bf16 packs 2 rows / sublane), and cap the tile so the double-buffered
    # X/out tiles plus the f32 hidden stay within the VMEM budget (v7x guard).
    n_tiles = max(1, math.ceil(B / block_b))
    tb = _round_up(math.ceil(B / n_tiles), 16)
    row_bytes = (2 * (max(IN, 128) + max(OUT, 128)) * 4   # x + out, 2 buffers
                 + max(HID, 128) * 4)                      # f32 hidden
    tb_cap = max(16, (vmem_budget_bytes // row_bytes) // 16 * 16)
    tb = min(tb, tb_cap)
    b_p = _round_up(B, tb)
    return tb, b_p


@functools.partial(jax.jit, static_argnames=("block_b",))
def mlp_forward(x, w1, b1, w2, b2, *, block_b: int = 512):
    B, IN = x.shape
    HID = w1.shape[1]
    OUT = w2.shape[1]

    VMEM_BUDGET = 32 * 1024 * 1024  # conservative vs v7x's 64 MiB physical
    TB, B_P = _batch_tiling(B, IN, HID, OUT, block_b, VMEM_BUDGET)

    # Only batch padding remains wrapper-side (needed for tile alignment);
    # padded rows compute garbage and are sliced off below.
    x_p = x if B_P == B else jnp.pad(x, ((0, B_P - B), (0, 0)))

    out = pl.pallas_call(
        mlp_kernel,
        out_shape=jax.ShapeDtypeStruct((B_P, OUT), jnp.float32),
        grid=(B_P // TB,),
        in_specs=[
            # X tiles stream along the batch grid axis (f32, cast in-kernel).
            pl.BlockSpec((TB, IN), lambda i: (i, 0)),
            # Weights / biases: constant index_map -> fetched once, resident.
            pl.BlockSpec((IN, HID), lambda i: (0, 0)),
            pl.BlockSpec((1, HID), lambda i: (0, 0)),
            pl.BlockSpec((HID, OUT), lambda i: (0, 0)),
            pl.BlockSpec((1, OUT), lambda i: (0, 0)),
        ],
        # Unpadded output: OUT (=10) equals the full last dim, so this block is
        # legal; the narrow masked store costs ~1 vreg per 8 rows vs ~12.8x the
        # HBM write bytes for a 128-lane f32 pad.
        out_specs=pl.BlockSpec((TB, OUT), lambda i: (i, 0)),
        compiler_params=pltpu.CompilerParams(
            # Batch tiles are independent -> shardable across v7x's 2 TCs.
            # TODO(synk): on v7x verify both TCs are used; if not, switch to
            # pltpu.CORE_PARALLEL / pl.core_map over a tensorcore mesh.
            dimension_semantics=("parallel",),
            vmem_limit_bytes=48 * 1024 * 1024,  # explicit guard (<64 MiB v7x)
        ),
    )(x_p, w1, b1, w2, b2)

    return out if B_P == B else out[:B]


if __name__ == "__main__":
    key = jax.random.PRNGKey(0)
    k_x, k_w1, k_b1, k_w2, k_b2 = jax.random.split(key, 5)

    B, IN, HID, OUT = 2, 20, 256, 10  # matches X = torch.rand(2, 20)

    # Deterministic "PyTorch-like" init: U(-1/sqrt(fan_in), 1/sqrt(fan_in)).
    x = jax.random.uniform(k_x, (B, IN), dtype=jnp.float32)
    bound1 = 1.0 / math.sqrt(IN)
    w1 = jax.random.uniform(k_w1, (IN, HID), jnp.float32, -bound1, bound1)
    b1 = jax.random.uniform(k_b1, (HID,), jnp.float32, -bound1, bound1)
    bound2 = 1.0 / math.sqrt(HID)
    w2 = jax.random.uniform(k_w2, (HID, OUT), jnp.float32, -bound2, bound2)
    b2 = jax.random.uniform(k_b2, (OUT,), jnp.float32, -bound2, bound2)

    # One-time param prep (bf16 weights for the MXU, f32 biases), outside jit.
    w1_p, b1_p, w2_p, b2_p = prepare_params(w1, b1, w2, b2)

    out = mlp_forward(x, w1_p, b1_p, w2_p, b2_p)
    out = jax.block_until_ready(out)
    assert out.shape == (B, OUT)

    # Reference 1: pure f32 forward pass (loose tolerance, bf16 MXU operands).
    ref_f32 = jnp.maximum(x @ w1 + b1, 0.0) @ w2 + b2
    assert jnp.allclose(out, ref_f32, atol=5e-2, rtol=5e-2)

    # Reference 2: precision-matched (bf16 operands, f32 accumulate/epilogue).
    bf = jnp.bfloat16
    h_ref = jnp.dot(x.astype(bf), w1.astype(bf),
                    preferred_element_type=jnp.float32) + b1
    h_ref = jnp.maximum(h_ref, 0.0)
    ref_bf = jnp.dot(h_ref.astype(bf), w2.astype(bf),
                     preferred_element_type=jnp.float32) + b2
    assert jnp.allclose(out, ref_bf, atol=1e-3, rtol=1e-3)

    print("KERNEL_OK")
</pallas_src>

<mosaic_0001>
module attributes {stable_mosaic.version = 11 : i64} {
  func.func @mlp_kernel(%arg0: i32, %arg1: memref<16x20xf32, #tpu.memory_space<vmem>>, %arg2: memref<20x256xbf16, #tpu.memory_space<vmem>>, %arg3: memref<1x256xf32, #tpu.memory_space<vmem>>, %arg4: memref<256x10xbf16, #tpu.memory_space<vmem>>, %arg5: memref<1x10xf32, #tpu.memory_space<vmem>>, %arg6: memref<16x10xf32, #tpu.memory_space<vmem>>) attributes {dimension_semantics = [#tpu.dimension_semantics<parallel>], iteration_bounds = array<i64: 1>, scalar_prefetch = 0 : i64, scratch_operands = 0 : i64, tpu.core_type = #tpu.core_type<tc>, window_params = [{transform_indices = @transform_0, window_bounds = array<i64: 16, 20>}, {pipeline_mode = #tpu.pipeline_mode<synchronous>, transform_indices = @transform_1, window_bounds = array<i64: 20, 256>}, {pipeline_mode = #tpu.pipeline_mode<synchronous>, transform_indices = @transform_2, window_bounds = array<i64: 1, 256>}, {pipeline_mode = #tpu.pipeline_mode<synchronous>, transform_indices = @transform_3, window_bounds = array<i64: 256, 10>}, {pipeline_mode = #tpu.pipeline_mode<synchronous>, transform_indices = @transform_4, window_bounds = array<i64: 1, 10>}, {transform_indices = @transform_5, window_bounds = array<i64: 16, 10>}]} {
    %c0 = arith.constant 0 : index
    %c0_0 = arith.constant 0 : index
    %0 = vector.load %arg1[%c0, %c0_0] : memref<16x20xf32, #tpu.memory_space<vmem>>, vector<16x20xf32>
    %1 = arith.truncf %0 : vector<16x20xf32> to vector<16x20xbf16>
    %c0_1 = arith.constant 0 : index
    %c0_2 = arith.constant 0 : index
    %2 = vector.load %arg2[%c0_1, %c0_2] : memref<20x256xbf16, #tpu.memory_space<vmem>>, vector<20x256xbf16>
    %cst = arith.constant dense<0.000000e+00> : vector<16x256xf32>
    %3 = tpu.matmul %1, %2, %cst {dimension_numbers = #tpu.dot_dimension_numbers<[1], [0], [0], [1], [0, 0, 1, 1], [], []>} : vector<16x20xbf16>, vector<20x256xbf16>, vector<16x256xf32> -> vector<16x256xf32>
    %c0_3 = arith.constant 0 : index
    %c0_4 = arith.constant 0 : index
    %4 = vector.load %arg3[%c0_3, %c0_4] : memref<1x256xf32, #tpu.memory_space<vmem>>, vector<1x256xf32>
    %5 = vector.broadcast %4 : vector<1x256xf32> to vector<16x256xf32>
    %6 = arith.addf %3, %5 : vector<16x256xf32>
    %cst_5 = arith.constant 0.000000e+00 : f32
    %7 = vector.broadcast %cst_5 : f32 to vector<16x256xf32>
    %8 = arith.maximumf %6, %7 : vector<16x256xf32>
    %9 = arith.truncf %8 : vector<16x256xf32> to vector<16x256xbf16>
    %c0_6 = arith.constant 0 : index
    %c0_7 = arith.constant 0 : index
    %10 = vector.load %arg4[%c0_6, %c0_7] : memref<256x10xbf16, #tpu.memory_space<vmem>>, vector<256x10xbf16>
    %cst_8 = arith.constant dense<0.000000e+00> : vector<16x10xf32>
    %11 = tpu.matmul %9, %10, %cst_8 {dimension_numbers = #tpu.dot_dimension_numbers<[1], [0], [0], [1], [0, 0, 1, 1], [], []>} : vector<16x256xbf16>, vector<256x10xbf16>, vector<16x10xf32> -> vector<16x10xf32>
    %c0_9 = arith.constant 0 : index
    %c0_10 = arith.constant 0 : index
    %12 = vector.load %arg5[%c0_9, %c0_10] : memref<1x10xf32, #tpu.memory_space<vmem>>, vector<1x10xf32>
    %13 = vector.broadcast %12 : vector<1x10xf32> to vector<16x10xf32>
    %14 = arith.addf %11, %13 : vector<16x10xf32>
    %c0_11 = arith.constant 0 : index
    %c0_12 = arith.constant 0 : index
    %15 = vector.load %arg6[%c0_11, %c0_12] : memref<16x10xf32, #tpu.memory_space<vmem>>, vector<16x10xf32>
    tpu.vector_store %arg6[%c0_11, %c0_12], %14 {strides = array<i32>} : memref<16x10xf32, #tpu.memory_space<vmem>>, vector<16x10xf32>,
    return
  }
  func.func @transform_0(%arg0: i32) -> (i32, i32) {
    %c0_i32 = arith.constant 0 : i32
    %c0_i32_0 = arith.constant 0 : i32
    return %arg0, %c0_i32 : i32, i32
  }
  func.func @transform_1(%arg0: i32) -> (i32, i32) {
    %c0_i32 = arith.constant 0 : i32
    %c0_i32_0 = arith.constant 0 : i32
    %c0_i32_1 = arith.constant 0 : i32
    return %c0_i32, %c0_i32_0 : i32, i32
  }
  func.func @transform_2(%arg0: i32) -> (i32, i32) {
    %c0_i32 = arith.constant 0 : i32
    %c0_i32_0 = arith.constant 0 : i32
    %c0_i32_1 = arith.constant 0 : i32
    return %c0_i32, %c0_i32_0 : i32, i32
  }
  func.func @transform_3(%arg0: i32) -> (i32, i32) {
    %c0_i32 = arith.constant 0 : i32
    %c0_i32_0 = arith.constant 0 : i32
    %c0_i32_1 = arith.constant 0 : i32
    return %c0_i32, %c0_i32_0 : i32, i32
  }
  func.func @transform_4(%arg0: i32) -> (i32, i32) {
    %c0_i32 = arith.constant 0 : i32
    %c0_i32_0 = arith.constant 0 : i32
    %c0_i32_1 = arith.constant 0 : i32
    return %c0_i32, %c0_i32_0 : i32, i32
  }
  func.func @transform_5(%arg0: i32) -> (i32, i32) {
    %c0_i32 = arith.constant 0 : i32
    %c0_i32_0 = arith.constant 0 : i32
    return %arg0, %c0_i32 : i32, i32
  }
}

</mosaic_0001>

<bundles_post_ra>
// kernel: mlp_forward.1
= control target key start
LH: loop header
LB: loop body
LE: loop exit
PB: predicated region body
PF: predicated region fallthrough
CT: control target
= control target key end

     0   :  { %v364_v1 = vmov 0   ;;  %vm58_vm0 = vcmask 1041408   ;;  %vm54_vm1 = vcmask 162816   ;;  %v29_v26 = vlaneseq  ;;  %s470_s1 = inlined_call_operand.vmem [shape: bf16[20,256], index: 1, kind: input, shape index: {}]   ;;  %s471_s0 = inlined_call_operand.vmem [shape: f32[16,20], index: 0, kind: input, shape index: {}]   ;;  %s472_s3 = inlined_call_operand.vmem [shape: bf16[256,10], index: 3, kind: input, shape index: {}]   ;;  %s473_s2 = inlined_call_operand.vmem [shape: f32[1,256], index: 2, kind: input, shape index: {}]   ;;  %s474_s4 = inlined_call_operand.vmem [shape: f32[1,10], index: 4, kind: input, shape index: {}]   ;;  %s475_s5 = inlined_call_operand.vmem [shape: f32[16,10], index: 5, kind: output, shape index: {}]  }
   0x1   :  { %v26_v0 = vld [vmem:[%s470_s1 + $0x10] sm:$0x33]  ;;  %97 = vmatprep.mubr.bf16.mxu0 %v364_v1  ;;  %v343_v2 = vld [vmem:[%s470_s1 + $0x4] ss:$8 sps:$4 sm:$0xff]   ;;  %v346_v4 = vld [vmem:[%s470_s1] ss:$8 sps:$4 sm:$0xff]  }
   0x2   :  { %v300_v3 = vcombine.high %v26_v0, %v26_v0  ;;  %v299_v5 = vcombine.low %v26_v0, %v26_v0  ;;  %v21_v6 = vld [vmem:[%s471_s0] sm:$0xff]  ;;  %v22_v7 = vld [vmem:[%s471_s0 + $0x8] sm:$0xff]  ;;  %65 = vmatprep.subr.bf16.mxu0 %v343_v2  ;;  %v352_v14 = vld [vmem:[%s472_s3 + $0x50] sm:$0xff]   ;;  %v30_v27 = vshrl.u32 %v29_v26, 7  ;;  %vm290_vm2 = vcmask 80896  }
   0x3   :  { %v348_v8 = vld [vmem:[%s472_s3 + $0x40] sm:$0xff]   ;;  %66 = vmatpush1.bf16.msra.mxu0 %v346_v4  ;;  %v350_v11 = vld [vmem:[%s472_s3 + $0x48] sm:$0xff]   ;;  %v23_v13 = vpack.c.bf16 %v22_v7, %v21_v6  ;;  %v353_v15 = vld [vmem:[%s472_s3 + $0x10] sm:$0xff]  }
   0x4   :  { %v349_v9 = vld [vmem:[%s472_s3] sm:$0xff]   ;;  %301 = vmatprep.subr.msk.bf16.mxu0 %vm58_vm0, %v300_v3  ;;  %v60_v10 = vsel %vm58_vm0, %v299_v5, 0  ;;  %320 = vmatprep.subr.bf16.mxu1 %v348_v8  ;;  %v351_v12 = vld [vmem:[%s472_s3 + $0x8] sm:$0xff]   ;;  %v354_v16 = vld [vmem:[%s472_s3 + $0x58] sm:$0xff]   ;;  %v31_v28 = vsub.s32 0, %v30_v27  ;;  %v35_v30 = vsub.s32 1, %v30_v27 }
   0x5   :  { %321 = vmatpush3.bf16.msra.mxu1 %v349_v9  ;;  %v355_v17 = vld [vmem:[%s472_s3 + $0x18] sm:$0xff]   ;;  %v356_v18 = vld [vmem:[%s472_s3 + $0x60] sm:$0xff]   ;;  %v358_v20 = vld [vmem:[%s472_s3 + $0x68] sm:$0xff]  }
   0x6   :  { %322 = vmatprep.subr.bf16.mxu1 %v350_v11  ;;  %v357_v19 = vld [vmem:[%s472_s3 + $0x20] sm:$0xff]   ;;  %v359_v21 = vld [vmem:[%s472_s3 + $0x28] sm:$0xff]   ;;  %v360_v22 = vld [vmem:[%s472_s3 + $0x70] sm:$0xff]  }
   0x7   :  { %68 = vmatpush1.bf16.msra.mxu0 %v60_v10  ;;  %v361_v23 = vld [vmem:[%s472_s3 + $0x30] sm:$0xff]   ;;  %v362_v24 = vld [vmem:[%s472_s3 + $0x78] sm:$0xff]   ;;  %v27_v29 = vld [vmem:[%s473_s2] sm:$0x3] }
   0x8   :  { %v363_v25 = vld [vmem:[%s472_s3 + $0x38] sm:$0xff]   ;;  %v32_v31 = vrot.slane %v27_v29, %v31_v28  ;;  %v36_v32 = vrot.slane %v27_v29, %v35_v30  ;;  %v303_v48 = vld [vmem:[%s474_s4] ss:$0 sm:$0xff] }
   0x9   :  { %323 = vmatpush3.bf16.msra.mxu1 %v351_v12 }
   0xa   :  { %302 = vmatmul.mubr.msk.bf16.vlgmr.msra.gmra.mrb[0].mxu0 %vm54_vm1, %v23_v13  ;;  %324 = vmatprep.subr.bf16.mxu1 %v352_v14 }
   0xd   :  { %325 = vmatpush3.bf16.msra.mxu1 %v353_v15 }
   0xe   :  { %326 = vmatprep.subr.bf16.mxu1 %v354_v16 }
  0x11   :  { %327 = vmatpush3.bf16.msra.mxu1 %v355_v17 }
  0x12   :  { %328 = vmatprep.subr.bf16.mxu1 %v356_v18 }
  0x15   :  { %329 = vmatpush3.bf16.msra.mxu1 %v357_v19 }
  0x16   :  { %330 = vmatprep.subr.bf16.mxu1 %v358_v20 }
  0x19   :  { %331 = vmatpush3.bf16.msra.mxu1 %v359_v21 }
  0x1a   :  { %332 = vmatprep.subr.bf16.mxu1 %v360_v22 }
  0x1d   :  { %333 = vmatpush3.bf16.msra.mxu1 %v361_v23 }
  0x1e   :  { %334 = vmatprep.subr.bf16.mxu1 %v362_v24 }
  0x21   :  { %335 = vmatpush3.bf16.msra.mxu1 %v363_v25 }
  0xdd   :  { %v99_v33 = vpop.f32.mrb[0].mxu0 }
  0xde   :  { %v100_v34 = vadd.f32 %v99_v33, %v32_v31  ;;  %v101_v35 = vpop.f32.mrb[1].mxu0 }
  0xdf   :  { %v102_v36 = vadd.f32 %v101_v35, %v36_v32  ;;  %v103_v37 = vpop.f32.mrb[2].mxu0 }
  0xe0   :  { %v104_v38 = vadd.f32 %v103_v37, %v32_v31  ;;  %v105_v39 = vpop.f32.mrb[3].mxu0  ;;  %v108_v41 = vmax.f32 %v100_v34, 0.0 }
  0xe1   :  { %v106_v40 = vadd.f32 %v105_v39, %v36_v32  ;;  %v109_v43 = vmax.f32 %v102_v36, 0.0 }
  0xe2   :  { %v110_v42 = vmax.f32 %v104_v38, 0.0 }
  0xe3   :  { %v111_v44 = vmax.f32 %v106_v40, 0.0 }
  0xe4   :  { %v112_v45 = vpack.c.bf16 %v110_v42, %v108_v41 }
  0xe5   :  { %v113_v46 = vpack.c.bf16 %v111_v44, %v109_v43 }
  0xe7   :  { %281 = vmatprep.mubr.bf16.mxu1 %v113_v46 }
  0xe8   :  { %282 = vmatmul.mubr.bf16.vlgmr.msra.gmra.mrb[0].mxu1 %v112_v45 }
 0x1bb   :  { %v336_v47 = vpop.f32.mrb[0].mxu1 }
 0x1bc   :  { %v337_v49 = vpop.f32.mrb[1].mxu1 }
 0x1bd   :  { %v338_v50 = vadd.f32 %v337_v49, %v336_v47  ;;  %v339_v51 = vpop.f32.mrb[2].mxu1 }
 0x1be   :  { %v340_v52 = vpop.f32.mrb[3].mxu1 }
 0x1bf   :  { %v284_v53 = vadd.f32 %v338_v50, %v303_v48  ;;  %v341_v54 = vadd.f32 %v340_v52, %v339_v51 }
 0x1c1   :  { %291 = vst.msk [vmem:[%s475_s5] sm:$0xff] %vm290_vm2, %v284_v53  ;;  %v287_v55 = vadd.f32 %v341_v54, %v303_v48 }
 0x1c3   :  { %292 = vst.msk [vmem:[%s475_s5 + $0x8] sm:$0xff] %vm290_vm2, %v287_v55 }

</bundles_post_ra>
